<compile_context>
chip_gen: v7x
topology: tpu7x:2x2x1
jax: 0.10.0
libtpu: 0.0.40
codegen_flags: <defaults>
</compile_context>

<pallas_src>
import math
import functools

import jax
import jax.numpy as jnp
from jax.experimental import pallas as pl
from jax.experimental.pallas import tpu as pltpu

N_BITS = 8
N_LEVELS = 2 ** N_BITS

_LANE = 128
_VMEM_LIMIT = 32 << 20        # scoped VMEM limit; safe on v5e/v6e/v7x
_GB_PACK_BUDGET = 6 << 20     # VMEM budget (double-buffered) for batch packing


def _pick_tile(dim, target, aligns=(128, 8)):
    """Largest tile <= target that evenly divides `dim` and is aligned to one
    of `aligns` (tried in order); falls back to the full dim (always legal)."""
    if dim <= target:
        return dim
    for align in aligns:
        t = (target // align) * align
        while t >= align:
            if dim % t == 0:
                return t
            t -= align
    return dim


# --------------------------------------------------------------------------
# Pre-quantization pass (mem-bound, once per tensor): exact integer levels.
# --------------------------------------------------------------------------
def _prequant_kernel(params_ref, x_ref, q_ref, *, n_max):
    inv_d = params_ref[0]
    zp = params_ref[1]
    x = x_ref[...].astype(jnp.float32)
    q = jnp.clip(jnp.round(x * inv_d) + zp, 0.0, n_max)
    q_ref[...] = q.astype(q_ref.dtype)


def _prequantize(x2, delta, zp, n_levels, q_dtype):
    """x2: (R, C) -> (R, C) integer quantization levels in q_dtype."""
    R, C = x2.shape
    tr = _pick_tile(R, 1024, aligns=(8,))
    params = jnp.stack([1.0 / delta, zp]).astype(jnp.float32)
    return pl.pallas_call(
        functools.partial(_prequant_kernel, n_max=float(n_levels - 1)),
        out_shape=jax.ShapeDtypeStruct((R, C), q_dtype),
        grid_spec=pltpu.PrefetchScalarGridSpec(
            num_scalar_prefetch=0,
            grid=(R // tr,),
            in_specs=[pl.BlockSpec(memory_space=pltpu.MemorySpace.SMEM),
                      pl.BlockSpec((tr, C), lambda i: (i, 0))],
            out_specs=pl.BlockSpec((tr, C), lambda i: (i, 0))),
        compiler_params=pltpu.CompilerParams(
            dimension_semantics=("arbitrary",),
            vmem_limit_bytes=_VMEM_LIMIT),
    )(params, x2)


# --------------------------------------------------------------------------
# Batched matmul kernels.
#   plain: o = A @ B
#   quant: o = dA*dB * (Aq@Bq - zb*rowsum(Aq) - za*colsum(Bq) + K*za*zb)
# Block shapes: a (gb,tm,tk), b (gb,tk,tn), o (gb,tm,tn),
#               rs (gb,tm,1), cs (gb,1,tn).
# --------------------------------------------------------------------------
def _bmm_plain_kernel(a_ref, b_ref, o_ref, *scratch, multi_k, acc_in_out):
    contrib = jnp.einsum("gmk,gkn->gmn", a_ref[...], b_ref[...],
                         preferred_element_type=jnp.float32)
    if not multi_k:
        o_ref[...] = contrib.astype(o_ref.dtype)
        return
    k = pl.program_id(3)
    if acc_in_out:
        # f32 output block is VMEM-resident across the k axis: accumulate
        # directly, no scratch and no finalize copy.
        @pl.when(k == 0)
        def _init():
            o_ref[...] = jnp.zeros_like(o_ref)
        o_ref[...] += contrib
    else:
        acc_ref = scratch[0]

        @pl.when(k == 0)
        def _init():
            acc_ref[...] = jnp.zeros_like(acc_ref)
        acc_ref[...] += contrib

        @pl.when(k == pl.num_programs(3) - 1)
        def _fin():
            o_ref[...] = acc_ref[...].astype(o_ref.dtype)


def _bmm_quant_kernel(params_ref, a_ref, b_ref, rs_ref, cs_ref, o_ref,
                      *scratch, multi_k, acc_in_out):
    # a/b hold exact integer levels (<= 255, exact in bf16) so the bf16 MXU
    # matmul with f32 accumulation is exact per K-block (tk <= 256).
    contrib = jnp.einsum("gmk,gkn->gmn", a_ref[...], b_ref[...],
                         preferred_element_type=jnp.float32)

    def _finish(acc):
        zp_a = params_ref[0]
        zp_b = params_ref[1]
        const = params_ref[2]          # K * zp_A * zp_B
        scale = params_ref[3]          # delta_A * delta_B
        return (acc - zp_b * rs_ref[...] - zp_a * cs_ref[...] + const) * scale

    if not multi_k:
        o_ref[...] = _finish(contrib).astype(o_ref.dtype)
        return

    k = pl.program_id(3)
    last = pl.num_programs(3) - 1
    if acc_in_out:
        @pl.when(k == 0)
        def _init():
            o_ref[...] = jnp.zeros_like(o_ref)
        o_ref[...] += contrib

        @pl.when(k == last)
        def _fin():
            o_ref[...] = _finish(o_ref[...])
    else:
        acc_ref = scratch[0]

        @pl.when(k == 0)
        def _init():
            acc_ref[...] = jnp.zeros_like(acc_ref)
        acc_ref[...] += contrib

        @pl.when(k == last)
        def _fin():
            o_ref[...] = _finish(acc_ref[...]).astype(o_ref.dtype)


# --------------------------------------------------------------------------
# pallas_call builder
# --------------------------------------------------------------------------
def _batched_matmul(a3, b3, quant, out_dtype):
    """a3: (G,M,K), b3: (G,K,N).  quant: None or dict with
    'params' f32[4] (SMEM), 'rs' (G,M,1) f32, 'cs' (G,1,N) f32."""
    G, M, K = a3.shape
    _, K2, N = b3.shape
    assert K == K2

    # Lane-dense stores: pad narrow N up to 128 lanes (padded columns sliced
    # off afterwards); avoids masked vst.msk partial stores.
    n_orig = N
    if N < _LANE:
        pad = _LANE - N
        b3 = jnp.pad(b3, ((0, 0), (0, 0), (0, pad)))
        if quant is not None:
            quant = dict(quant)
            quant['cs'] = jnp.pad(quant['cs'], ((0, 0), (0, 0), (0, pad)))
        N = _LANE

    quantize = quant is not None
    # Quant path caps tk at 256 so each per-block partial sum of 255*255
    # products stays < 2^24 (exact f32 accumulation on the MXU).
    tm = _pick_tile(M, 512, aligns=(128, 8))
    tk = _pick_tile(K, 256 if quantize else 512, aligns=(128,))
    tn = _pick_tile(N, 512, aligns=(128,))

    out_item = jnp.dtype(out_dtype).itemsize

    # Small whole-matmul tiles: pack batch elements per grid step to amortize
    # the ~0.35us fixed per-step cost; keep >=2 grid steps for megacore.
    if tm == M and tk == K and tn == N:
        per_g = (2 * (M * K * a3.dtype.itemsize + K * N * b3.dtype.itemsize)
                 + 2 * M * N * out_item)
        gb = max(1, min(G, _GB_PACK_BUDGET // max(per_g, 1)))
        if G >= 2:
            gb = min(gb, max(1, G // 2))
        while G % gb:
            gb -= 1
    else:
        gb = 1

    n_k = K // tk
    multi_k = n_k > 1
    acc_in_out = multi_k and jnp.dtype(out_dtype) == jnp.dtype(jnp.float32)
    grid = (G // gb, M // tm, N // tn, n_k)

    a_spec = pl.BlockSpec((gb, tm, tk), lambda g, i, j, k: (g, i, k))
    b_spec = pl.BlockSpec((gb, tk, tn), lambda g, i, j, k: (g, k, j))
    o_spec = pl.BlockSpec((gb, tm, tn), lambda g, i, j, k: (g, i, j))
    scratch = ([pltpu.VMEM((gb, tm, tn), jnp.float32)]
               if (multi_k and not acc_in_out) else [])

    if quantize:
        kernel = functools.partial(_bmm_quant_kernel, multi_k=multi_k,
                                   acc_in_out=acc_in_out)
        in_specs = [
            pl.BlockSpec(memory_space=pltpu.MemorySpace.SMEM),
            a_spec, b_spec,
            pl.BlockSpec((gb, tm, 1), lambda g, i, j, k: (g, i, 0)),
            pl.BlockSpec((gb, 1, tn), lambda g, i, j, k: (g, 0, j)),
        ]
        operands = (quant['params'], a3, b3, quant['rs'], quant['cs'])
    else:
        kernel = functools.partial(_bmm_plain_kernel, multi_k=multi_k,
                                   acc_in_out=acc_in_out)
        in_specs = [a_spec, b_spec]
        operands = (a3, b3)

    cost = pl.CostEstimate(
        flops=2 * G * M * N * K,
        transcendentals=0,
        bytes_accessed=(G * M * K * a3.dtype.itemsize * (N // tn)
                        + G * K * N * b3.dtype.itemsize * (M // tm)
                        + G * M * N * out_item))

    out = pl.pallas_call(
        kernel,
        out_shape=jax.ShapeDtypeStruct((G, M, N), out_dtype),
        grid_spec=pltpu.PrefetchScalarGridSpec(
            num_scalar_prefetch=0,
            grid=grid,
            in_specs=in_specs,
            out_specs=o_spec,
            scratch_shapes=scratch),
        compiler_params=pltpu.CompilerParams(
            dimension_semantics=("parallel", "parallel", "parallel",
                                 "arbitrary"),
            vmem_limit_bytes=_VMEM_LIMIT),
        cost_estimate=cost,
    )(*operands)

    if n_orig != N:
        out = out[:, :, :n_orig]
    return out


# --------------------------------------------------------------------------
# Calibration (UniformQuantizer.init_quantization_scale, channel_wise=False).
# Runs once in plain JAX -- not the hot path.
# --------------------------------------------------------------------------
def _uniform_calibrate(x, n_bits=N_BITS):
    n_levels = 2 ** n_bits
    xf = x.reshape(-1).astype(jnp.float32)
    best_score = jnp.float32(1e10)
    delta = jnp.float32(1.0)
    zero_point = jnp.float32(0.0)
    for pct in (0.999, 0.9999, 0.99999):
        new_max = jnp.quantile(xf, pct)
        new_min = jnp.quantile(xf, 1.0 - pct)
        # eps guard against degenerate (constant) tensors.
        d = jnp.maximum((new_max - new_min) / (n_levels - 1), 1e-8)
        zp = jnp.round(-new_min / d)
        x_q = jnp.clip(jnp.round(x / d) + zp, 0.0, float(n_levels - 1))
        x_dq = (x_q - zp) * d
        score = jnp.mean(jnp.abs(x - x_dq) ** 2)   # lp_loss(p=2, 'all')
        better = score < best_score
        delta = jnp.where(better, d, delta)
        zero_point = jnp.where(better, zp, zero_point)
        best_score = jnp.minimum(best_score, score)
    return delta, zero_point


def _uniform_forward_ref(x, delta, zp, n_bits=N_BITS):
    # Reference fake-quant; uses x*(1/delta) to match the kernel exactly.
    n_levels = 2 ** n_bits
    inv = 1.0 / delta
    x_q = jnp.clip(jnp.round(x * inv) + zp, 0.0, float(n_levels - 1))
    return (x_q - zp) * delta


# --------------------------------------------------------------------------
# QuantMatMul wrapper (mirrors the torch module's state machine)
# --------------------------------------------------------------------------
class QuantMatMul:
    def __init__(self, input_quant_params=None):
        params = dict(input_quant_params or {})
        self.log_quant = bool(params.pop('log_quant', False))
        # TODO(synk): LogSqrt2Quantizer (log_quant=True) path for quantizer_A
        # is not implemented; only the default UniformQuantizer is translated.
        self.n_bits = int(params.get('n_bits', N_BITS))
        self.n_levels = 2 ** self.n_bits
        self.use_input_quant = False
        self.inited = False
        self.delta_A = self.zp_A = None
        self.delta_B = self.zp_B = None

    def set_quant_state(self, input_quant=False, weight_quant=False):
        self.use_input_quant = input_quant

    def __call__(self, A, B):
        assert A.shape[:-2] == B.shape[:-2], "leading dims must match"
        assert A.shape[-1] == B.shape[-2], "inner dims must match"
        lead = A.shape[:-2]
        M, K = A.shape[-2], A.shape[-1]
        N = B.shape[-1]
        G = int(math.prod(lead)) if lead else 1

        A3 = A.reshape(G, M, K)
        B3 = B.reshape(G, K, N)
        out_dtype = jnp.result_type(A.dtype, B.dtype)

        if self.use_input_quant:
            if not self.inited:
                self.delta_A, self.zp_A = _uniform_calibrate(A3, self.n_bits)
                self.delta_B, self.zp_B = _uniform_calibrate(B3, self.n_bits)
                self.inited = True
            # Pre-quantize once: exact integer levels.  bf16 is exact for
            # <= 8-bit levels; wider quantizers fall back to f32 storage.
            q_dtype = jnp.bfloat16 if self.n_levels <= 256 else jnp.float32
            a_q = _prequantize(A3.reshape(G * M, K), self.delta_A, self.zp_A,
                               self.n_levels, q_dtype).reshape(G, M, K)
            b_q = _prequantize(B3.reshape(G * K, N), self.delta_B, self.zp_B,
                               self.n_levels, q_dtype).reshape(G, K, N)
            # Full-K level sums for the analytic zero-point correction,
            # computed once outside the matmul's hot loop.
            rs = jnp.sum(a_q.astype(jnp.float32), axis=2, keepdims=True)
            cs = jnp.sum(b_q.astype(jnp.float32), axis=1, keepdims=True)
            params = jnp.stack([
                self.zp_A, self.zp_B,
                float(K) * self.zp_A * self.zp_B,
                self.delta_A * self.delta_B,
            ]).astype(jnp.float32)
            out = _batched_matmul(
                a_q, b_q, {'params': params, 'rs': rs, 'cs': cs}, out_dtype)
        else:
            out = _batched_matmul(A3, B3, None, out_dtype)

        return out.reshape(lead + (M, N))


# --------------------------------------------------------------------------
if __name__ == "__main__":
    key = jax.random.PRNGKey(0)
    k_a, k_b = jax.random.split(key)

    # Attention-like shapes: A = scores (b,h,seq,seq), B = values (b,h,seq,d)
    batch, heads, seq, head_dim = 2, 2, 8, 32
    A = jax.random.uniform(k_a, (batch, heads, seq, seq), dtype=jnp.float32)
    B = jax.random.normal(k_b, (batch, heads, seq, head_dim), dtype=jnp.float32)

    mm = QuantMatMul()

    # Default path: use_input_quant=False -> plain batched matmul.
    out = mm(A, B)
    jax.block_until_ready(out)
    ref = jnp.einsum("bhmk,bhkn->bhmn", A, B,
                     precision=jax.lax.Precision.HIGHEST)
    assert out.shape == (batch, heads, seq, head_dim)
    assert out.dtype == jnp.float32
    assert jnp.allclose(out, ref, atol=1e-4, rtol=1e-4), "plain matmul mismatch"

    # Quantized path: fake-quant A & B (uniform 8-bit) then matmul.
    mm.set_quant_state(input_quant=True)
    out_q = mm(A, B)
    jax.block_until_ready(out_q)
    A_q = _uniform_forward_ref(A, mm.delta_A, mm.zp_A)
    B_q = _uniform_forward_ref(B, mm.delta_B, mm.zp_B)
    ref_q = jnp.einsum("bhmk,bhkn->bhmn", A_q, B_q,
                       precision=jax.lax.Precision.HIGHEST)
    assert jnp.allclose(out_q, ref_q, atol=1e-4, rtol=1e-4), \
        "quantized matmul mismatch"

    print("KERNEL_OK")
</pallas_src>

<mosaic_0001>
module attributes {stable_mosaic.version = 11 : i64} {
  func.func @_bmm_plain_kernel(%arg0: i32, %arg1: i32, %arg2: i32, %arg3: i32, %arg4: memref<2x8x8xf32, #tpu.memory_space<vmem>>, %arg5: memref<2x8x128xf32, #tpu.memory_space<vmem>>, %arg6: memref<2x8x128xf32, #tpu.memory_space<vmem>>) attributes {dimension_semantics = [#tpu.dimension_semantics<parallel>, #tpu.dimension_semantics<parallel>, #tpu.dimension_semantics<parallel>, #tpu.dimension_semantics<arbitrary>], iteration_bounds = array<i64: 2, 1, 1, 1>, scalar_prefetch = 0 : i64, scratch_operands = 0 : i64, tpu.core_type = #tpu.core_type<tc>, window_params = [{transform_indices = @transform_0, window_bounds = array<i64: 2, 8, 8>}, {transform_indices = @transform_1, window_bounds = array<i64: 2, 8, 128>}, {transform_indices = @transform_2, window_bounds = array<i64: 2, 8, 128>}]} {
    %c0 = arith.constant 0 : index
    %c0_0 = arith.constant 0 : index
    %c0_1 = arith.constant 0 : index
    %0 = vector.load %arg4[%c0, %c0_0, %c0_1] : memref<2x8x8xf32, #tpu.memory_space<vmem>>, vector<2x8x8xf32>
    %c0_2 = arith.constant 0 : index
    %c0_3 = arith.constant 0 : index
    %c0_4 = arith.constant 0 : index
    %1 = vector.load %arg5[%c0_2, %c0_3, %c0_4] : memref<2x8x128xf32, #tpu.memory_space<vmem>>, vector<2x8x128xf32>
    "tpu.trace_start"() <{level = 10 : i32, message = "gmk,gkn->gmn"}> : () -> ()
    %cst = arith.constant dense<0.000000e+00> : vector<2x8x128xf32>
    %2 = tpu.matmul %0, %1, %cst {dimension_numbers = #tpu.dot_dimension_numbers<[2], [1], [1], [2], [0, 0, 0, 1, 1, 2], [0], [0]>} : vector<2x8x8xf32>, vector<2x8x128xf32>, vector<2x8x128xf32> -> vector<2x8x128xf32>
    "tpu.trace_stop"() : () -> ()
    %c0_5 = arith.constant 0 : index
    %c0_6 = arith.constant 0 : index
    %c0_7 = arith.constant 0 : index
    %3 = vector.load %arg6[%c0_5, %c0_6, %c0_7] : memref<2x8x128xf32, #tpu.memory_space<vmem>>, vector<2x8x128xf32>
    tpu.vector_store %arg6[%c0_5, %c0_6, %c0_7], %2 {strides = array<i32>} : memref<2x8x128xf32, #tpu.memory_space<vmem>>, vector<2x8x128xf32>,
    return
  }
  func.func @transform_0(%arg0: i32, %arg1: i32, %arg2: i32, %arg3: i32) -> (i32, i32, i32) {
    %c0_i32 = arith.constant 0 : i32
    return %arg0, %arg1, %arg3 : i32, i32, i32
  }
  func.func @transform_1(%arg0: i32, %arg1: i32, %arg2: i32, %arg3: i32) -> (i32, i32, i32) {
    %c0_i32 = arith.constant 0 : i32
    return %arg0, %arg3, %arg2 : i32, i32, i32
  }
  func.func @transform_2(%arg0: i32, %arg1: i32, %arg2: i32, %arg3: i32) -> (i32, i32, i32) {
    %c0_i32 = arith.constant 0 : i32
    return %arg0, %arg1, %arg2 : i32, i32, i32
  }
}

</mosaic_0001>

<bundles_post_ra>
// kernel: tpu_custom_call.1
= control target key start
LH: loop header
LB: loop body
LE: loop exit
PB: predicated region body
PF: predicated region fallthrough
CT: control target
= control target key end

     0   :  { %7 = vsyncpa [#allocation3], 0  ;;  %s1051_s0 = inlined_call_operand.hbm [shape: f32[4,8,8], index: 0, kind: input, shape index: {}]   ;;  %s1052_s1 = inlined_call_operand.hbm [shape: f32[4,8,128], index: 1, kind: input, shape index: {}]   ;;  %s1053_s2 = inlined_call_operand.hbm [shape: f32[4,8,128], index: 2, kind: output, shape index: {}]  }
   0x1   :  { %9 = vsyncpa [#allocation3 + $0x1], 0 }
   0x2   :  { %10 = vsyncpa [#allocation6], 0 }
   0x3   :  { %12 = vsyncpa [#allocation6 + $0x1], 0 }
   0x4   :  { %13 = vsyncpa [#allocation4], 0 }
   0x5   :  { %15 = vsyncpa [#allocation4 + $0x1], 0  ;;  %s815_s9 = smov 0   ;;  %s817_s10 = smov 0  }
   0x6   :  { %s819_s11 = smov 0   ;;  %s821_s12 = smov 0  }
   0x7   :  { %s823_s13 = smov 0   ;;  %s825_s14 = smov 0  }
   0x8 LB: > { %s532_s15 = sadd.s32 4294967295, %s789_s14   ;;  %s533_s16 = sadd.s32 4294967294, %s789_s14   ;;  %s789_s14 = sphi %s825_s14, %s21_s14   ;;  %s785_s13 = sphi %s823_s13, %s1071_s13   ;;  %s781_s12 = sphi %s821_s12, %s1070_s12   ;;  %s777_s11 = sphi %s819_s11, %s1069_s11   ;;  %s773_s10 = sphi %s817_s10, %s1068_s10   ;;  %s769_s9 = sphi %s815_s9, %s1067_s9  }
   0x9   : > { %s47_s17 = sadd.s32 1, %s785_s13  ;;  %s58_s18 = sadd.s32 1, %s777_s11 }
   0xa   : > { %p49_p0 = scmp.ge.s32.totalorder %s47_s17, 2  ;;  %p65_p1 = scmp.ne.s32.totalorder %s777_s11, %s773_s10 }
   0xb   : > { %p66_p2 = scmp.eq.s32.totalorder %s789_s14, 0  ;;  %p71_p3 = scmp.ne.s32.totalorder %s773_s10, %s769_s9 }
   0xc   : > { %s1073_s17 = smov (%p49_p0, %s47_s17), 0  ;;  %p72_p5 = scmp.eq.s32.totalorder %s532_s15, 0 }
   0xd   : > { %p856_p4 = por %p66_p2, %p65_p1  ;;  %s51_s20 = ssub.s32 %s785_s13, %s1073_s17 }
   0xe   : > { %p129_p6 = scmp.eq.s32.totalorder %s532_s15, 1  ;;  %p56_p7 = scmp.eq.s32.totalorder %s51_s20, 0 }
   0xf   : > { %p862_p8 = por %p72_p5, %p71_p3  ;;  %p135_p10 = scmp.eq.s32.totalorder %s533_s16, 1 }
  0x10   : > { %p866_p9 = por %p129_p6, %p65_p1  ;;  %p587_p13 = scmp.lt.s32.totalorder %s789_s14, 2 }
  0x11   : > { %s1057_s21 = scalar_select %p862_p8, 1, 0 }
  0x12   : > { %s1058_s22 = scalar_select %p866_p9, 1, 0 }
  0x13   : > { %s871_s23 = scalar_select %p56_p7, %s777_s11, %s58_s18  }
  0x14   : > { %p873_p11 = por %p135_p10, %p71_p3  ;;  %s880_s25 = sand.u32 1, %s777_s11  }
  0x15   : > { %s536_s26 = sshll.u32 %s880_s25, 4  ;;  %s553_s27 = sshll.u32 %s785_s13, 8 }
  0x16   : > { %s1059_s24 = scalar_select %p873_p11, 1, 0 }
  0x17   : > { %s889_s30 = scalar_lea.hbm %s1051_s0, %s553_s27  ;;  %s159_s3 = scalar_lea.vmem [#allocation2], %s536_s26 }
  0x18   : > { %s168_s4 = sshll.u32 %s159_s3, 4  ;;  %p897_p0 = pnand %p587_p13, %p856_p4  ;;  %s893_s4 = int_to_ptr.vmem [resolvable:$true] %s168_s4 }
  0x19   : > { %s156_s6 = scalar_lea.sflag [#allocation3], %s880_s25  ;;  %s643_s7 = scalar_lea.hbm %s889_s30, 256 }
  0x1a   : > { %p644_p2 = scmp.ne.s32.totalorder %s889_s30, %s643_s7  ;;  %p645_p3 = pneg %p897_p0 }
  0x1b   : > { %s648_s16 = scalar_lea.hbm %s1051_s0, 512  ;;  %p649_p4 = scmp.lt.u32.totalorder %s889_s30, %s1051_s0 }
  0x1c   : > { %p646_p5 = pnand %p645_p3, %p644_p2  ;;  %p650_p7 = scmp.lt.u32.totalorder %s648_s16, %s643_s7 }
  0x1d   : > { %p652_p13 = scmp.lt.u32.totalorder %s643_s7, %s889_s30 }
  0x1e   : > { %p647_p6 = pneg %p646_p5  ;;  %p651_p10 = por %p650_p7, %p649_p4 }
  0x20   : > { %p653_p12 = por %p652_p13, %p651_p10 }
  0x22   : > { %p654_p1 = pnand %p653_p12, %p647_p6 }
  0x24   : > { %657 = shalt.err (!%p654_p1)
}
  0x25   : > { %s658_s20 = scalar_lea.vmem %s893_s4, 256  ;;  %s791_s28 = smov [#allocation2]  }
  0x26   : > { %p659_p2 = scmp.ne.s32.totalorder %s893_s4, %s658_s20  ;;  %s663_s29 = sshll.u32 %s791_s28, 4  ;;  %s664_s29 = int_to_ptr.vmem [resolvable:$false] %s663_s29 }
  0x27   : > { %s665_s3 = scalar_lea.vmem %s664_s29, 512  ;;  %p666_p9 = scmp.lt.s32.totalorder %s893_s4, %s664_s29 }
  0x28   : > { %p661_p5 = pnand %p659_p2, %p645_p3  ;;  %p667_p4 = scmp.lt.s32.totalorder %s665_s3, %s658_s20 }
  0x2a   : > { %p662_p11 = pneg %p661_p5  ;;  %p668_p7 = por %p667_p4, %p666_p9 }
  0x2c   : > { %p669_p10 = pnand %p668_p7, %p662_p11 }
  0x2e   : > { %672 = shalt.err (!%p669_p10)
}
  0x2f   : > { %s792_s7 = smov 128   ;;  %s793_s8 = smov 8  }
  0x30   : > { %579 = dma.hbm_to_vmem [thread:$0]  (!%p897_p0), %s889_s30, 256, %s893_s4, %s156_s6, %s792_s7, %s792_s7, %s793_s8  }
  0x31   : > { %p199_p9 = scmp.lt.s32.totalorder %s789_s14, 3  ;;  %s939_s18 = scalar_lea.hbm %s1052_s1, %s553_s27 }
  0x32   : > { %p1061_p11 = scmp.ge.s32.totalorder %s789_s14, 1  ;;  %s182_s20 = scalar_lea.vmem [#allocation5], %s536_s26 }
  0x33   : > { %s191_s28 = sshll.u32 %s182_s20, 4  ;;  %s179_s30 = scalar_lea.sflag [#allocation6], %s880_s25  ;;  %s949_s28 = int_to_ptr.vmem [resolvable:$true] %s191_s28 }
  0x34   : > { %p943_p12 = pnand %p1061_p11, %p199_p9  ;;  %s673_s4 = scalar_lea.hbm %s939_s18, 256 }
  0x35   : > { %p674_p1 = scmp.ne.s32.totalorder %s939_s18, %s673_s4  ;;  %s678_s29 = scalar_lea.hbm %s1052_s1, 512 }
  0x36   : > { %p679_p2 = scmp.lt.u32.totalorder %s939_s18, %s1052_s1  ;;  %p680_p5 = scmp.lt.u32.totalorder %s678_s29, %s673_s4 }
  0x37   : > { %p676_p6 = pnand %p674_p1, %p645_p3  ;;  %p682_p7 = scmp.lt.u32.totalorder %s673_s4, %s939_s18 }
  0x38   : > { %p681_p4 = por %p680_p5, %p679_p2 }
  0x39   : > { %p677_p13 = pneg %p676_p6 }
  0x3a   : > { %p683_p10 = por %p682_p7, %p681_p4 }
  0x3c   : > { %p684_p9 = pnand %p683_p10, %p677_p13 }
  0x3e   : > { %687 = shalt.err (!%p684_p9)
}
  0x3f   : > { %s688_s26 = scalar_lea.vmem %s949_s28, 256  ;;  %s794_s16 = smov [#allocation5]  }
  0x40   : > { %p689_p11 = scmp.ne.s32.totalorder %s949_s28, %s688_s26  ;;  %s693_s20 = sshll.u32 %s794_s16, 4  ;;  %s694_s20 = int_to_ptr.vmem [resolvable:$false] %s693_s20 }
  0x41   : > { %s695_s27 = scalar_lea.vmem %s694_s20, 512  ;;  %p696_p8 = scmp.lt.s32.totalorder %s949_s28, %s694_s20 }
  0x42   : > { %p691_p1 = pnand %p689_p11, %p645_p3  ;;  %p697_p2 = scmp.lt.s32.totalorder %s695_s27, %s688_s26 }
  0x44   : > { %p692_p6 = pneg %p691_p1  ;;  %p698_p5 = por %p697_p2, %p696_p8 }
  0x46   : > { %p699_p4 = pnand %p698_p5, %p692_p6 }
  0x48   : > { %702 = shalt.err (!%p699_p4)
}
  0x49   : > { %582 = dma.hbm_to_vmem [thread:$0]  (!%p897_p0), %s939_s18, 256, %s949_s28, %s179_s30, %s792_s7, %s792_s7, %s793_s8  }
  0x4a   : > { %203 = sbr.rel (%p943_p12) target bundleno = 315 (0x13b), region = 28  ;;  %s983_s4 = sand.u32 (!%p943_p12), 1, %s773_s10  }
  0x4b   : > { %s543_s6 = sshll.u32 (!%p943_p12), %s983_s4, 4  ;;  %s206_s29 = scalar_lea.sflag (!%p943_p12), [#allocation3], %s983_s4 }
  0x4c   : > { %s209_s5 = scalar_lea.vmem (!%p943_p12), [#allocation2], %s543_s6  ;;  %p1063_p8 = scmp.ne.s32.totalorder (!%p943_p12), %s1057_s21, 0 }
  0x51   : > { %756 = dma.done.wait (%p1063_p8), %s206_s29, 256  }
  0x52   : > { %758 = vsyncadd (%p1063_p8), %s206_s29, 4294967040  ;;  %s215_s25 = scalar_lea.sflag [#allocation6], %s983_s4  ;;  %s218_s7 = scalar_lea.vmem [#allocation5], %s543_s6 }
  0x53   : > { %760 = dma.done.wait (%p1063_p8), %s215_s25, 256  }
  0x54   : > { %762 = vsyncadd (%p1063_p8), %s215_s25, 4294967040  ;;  %v795_v0 = vmov 0.0   ;;  %vm796_vm0 = vmmov 0   ;;  %vm251_vm1 = vcmask 64512   ;;  %v249_v1 = vld [vmem:[%s218_s7] sm:$0xff]  ;;  %v250_v2 = vld [vmem:[%s218_s7 + $0x8] sm:$0xff] }
  0x55   : > { %560 = vmatprep.subr.mxu0 %v795_v0  ;;  %565 = vmatprep.subr.mxu1 %v795_v0  ;;  %v247_v3 = vld [vmem:[%s209_s5] sm:$0xff]  ;;  %v248_v4 = vld [vmem:[%s209_s5 + $0x8] sm:$0xff]  ;;  %s243_s21 = scalar_lea.vmem [#allocation7], %s543_s6  ;;  %s555_s18 = sshll.u32 %s781_s12, 8 }
  0x56   : > { %562 = vmatprep.mubr.msk.f32.mxu0 %vm796_vm0, %v795_v0  ;;  %567 = vmatprep.mubr.msk.f32.mxu1 %vm796_vm0, %v795_v0  ;;  %s416_s8 = sshll.u32 %s243_s21, 4  ;;  %s1002_s30 = scalar_lea.hbm %s1053_s2, %s555_s18  ;;  %s997_s8 = int_to_ptr.vmem [resolvable:$true] %s416_s8 }
  0x57   : > { %561 = vmatpush3.msra.mxu0 %v249_v1  ;;  %566 = vmatpush3.msra.mxu1 %v250_v2  ;;  %s401_s3 = scalar_lea.sflag [#allocation4], %s983_s4  ;;  %s703_s15 = scalar_lea.vmem %s997_s8, 256 }
  0x58   : > { %563 = vmatmul.mubr.msk.f32.vlgmr.msra.gmra.mrb[0].mxu0 %vm251_vm1, %v247_v3  ;;  %568 = vmatmul.mubr.msk.f32.vlgmr.msra.gmra.mrb[0].mxu1 %vm251_vm1, %v248_v4  ;;  %p704_p0 = scmp.ne.s32.totalorder %s997_s8, %s703_s15  ;;  %p1064_p3 = scmp.ne.s32.totalorder %s1058_s22, 0 }
  0x59   : > { %s797_s12 = smov [#allocation7]  }
  0x5a   : > { %p705_p12 = pnand %p704_p0, %p1064_p3  ;;  %s707_s26 = sshll.u32 %s797_s12, 4  ;;  %s708_s26 = int_to_ptr.vmem [resolvable:$false] %s707_s26 }
  0x5b   : > { %s709_s16 = scalar_lea.vmem %s708_s26, 512  ;;  %p710_p7 = scmp.lt.s32.totalorder %s997_s8, %s708_s26 }
  0x5c   : > { %p706_p13 = pneg %p705_p12  ;;  %p711_p10 = scmp.lt.s32.totalorder %s709_s16, %s703_s15 }
  0x5e   : > { %p712_p9 = por %p711_p10, %p710_p7 }
  0x60   : > { %p713_p11 = pnand %p712_p9, %p706_p13 }
 0x12b   : > { %v321_v5 = vpop.f32.mrb[0].mxu0  ;;  %v394_v6 = vpop.f32.mrb[0].mxu1 }
 0x12c   : > { %398 = vst [vmem:[%s243_s21] sm:$0xff] %v321_v5  ;;  %399 = vst [vmem:[%s243_s21 + $0x8] sm:$0xff] %v394_v6  ;;  %v564_v7 = vpop.f32.mrb[1].mxu0  ;;  %v569_v8 = vpop.f32.mrb[1].mxu1 }
 0x12d   : > { %716 = shalt.err (!%p713_p11)
}
 0x12e   : > { %s717_s20 = scalar_lea.hbm %s1002_s30, 256  ;;  %s721_s29 = scalar_lea.hbm %s1053_s2, 512 }
 0x12f   : > { %p718_p1 = scmp.ne.s32.totalorder %s1002_s30, %s717_s20  ;;  %p722_p5 = scmp.lt.u32.totalorder %s1002_s30, %s1053_s2 }
 0x130   : > { %p723_p4 = scmp.lt.u32.totalorder %s721_s29, %s717_s20  ;;  %p725_p0 = scmp.lt.u32.totalorder %s717_s20, %s1002_s30 }
 0x131   : > { %p719_p6 = pnand %p718_p1, %p1064_p3 }
 0x132   : > { %p724_p8 = por %p723_p4, %p722_p5 }
 0x133   : > { %p720_p2 = pneg %p719_p6 }
 0x134   : > { %p726_p12 = por %p725_p0, %p724_p8 }
 0x136   : > { %p727_p13 = pnand %p726_p12, %p720_p2 }
 0x138   : > { %730 = shalt.err (!%p727_p13)
}
 0x139   : > { %s798_s7 = smov 128   ;;  %s799_s21 = smov 8  }
 0x13a   : > { %574 = dma.vmem_to_hbm [thread:$0]  (%p1064_p3), %s997_s8, 256, %s1002_s30, %s401_s3, %s798_s7, %s798_s7, %s799_s21  }
 0x13b PF: > { %s431_s18 = sand.u32 1, %s769_s9   ;;  %p1065_p7 = scmp.ne.s32.totalorder %s1059_s24, 0 }
 0x13c   : > { %p1066_p10 = scmp.ge.s32.totalorder %s789_s14, 2  ;;  %s432_s19 = scalar_lea.sflag [#allocation4], %s431_s18 }
 0x13e   : > { %p584_p9 = pnand %p1066_p10, %p1065_p7 }
 0x140   : > { %764 = dma.done.wait (!%p584_p9), %s432_s19, 256  }
 0x141   : > { %766 = vsyncadd (!%p584_p9), %s432_s19, 4294967040  ;;  %s21_s14 = sadd.s32 1, %s789_s14   ;;  %s1067_s9 = smov %s773_s10 }
 0x142   : > { %p18_p11 = scmp.ge.s32.totalorder %s21_s14, 4   ;;  %s1068_s10 = smov %s777_s11 }
 0x143   : > { %s1069_s11 = smov %s871_s23  ;;  %s1070_s12 = smov %s785_s13 }
 0x144   : > { %s1071_s13 = smov %s1073_s17  ;;  %20 = sbr.rel (!%p18_p11) target bundleno = 8 (0x8), region = 86 }
 0x14b   :  { %437 = vsyncpa [#allocation3], 1 }
 0x14c   :  { %439 = vsyncpa [#allocation3 + $0x1], 1 }
 0x14d   :  { %440 = vsyncpa [#allocation6], 1 }
 0x14e   :  { %442 = vsyncpa [#allocation6 + $0x1], 1 }
 0x14f   :  { %443 = vsyncpa [#allocation4], 1 }
 0x150   :  { %445 = vsyncpa [#allocation4 + $0x1], 1 }

</bundles_post_ra>
